<compile_context>
chip_gen: v7x
topology: tpu7x:2x2x1
jax: 0.10.0
libtpu: 0.0.40
codegen_flags: <defaults>
</compile_context>

<pallas_src>
import jax
import jax.numpy as jnp
from jax.experimental import pallas as pl
from jax.experimental.pallas import tpu as pltpu


def _round_up(x, m):
    return ((x + m - 1) // m) * m


def _is_v5():
    try:
        return "v5" in jax.devices()[0].device_kind.lower()
    except Exception:
        return False


def _device_caps():
    """Returns (tm_cap, vmem_budget_bytes); conservative (v7x-safe) on unknown HW."""
    vmem = None
    try:
        vmem = int(pltpu.get_tpu_info().vmem_capacity_bytes)
    except Exception:
        pass
    if vmem is None:
        try:
            kind = jax.devices()[0].device_kind.lower()
            vmem = (128 << 20) if ("v5" in kind or "v6" in kind) else (64 << 20)
        except Exception:
            vmem = 64 << 20
    if vmem >= (128 << 20):
        return 2048, 96 << 20   # v5e / v6e: 128 MiB VMEM, lean on big batch tiles
    return 512, 48 << 20        # v7x-class: 64 MiB per TensorCore, stay conservative


def _head_kernel(x_ref, w1_ref, b1_ref, w2_ref, b2_ref, w3_ref, b3_ref, o_ref):
    # x_ref: (TM, H). w*: (in, out) bf16, resident. b*: (1, out) in the
    # elementwise compute dtype (bf16 on v6e/v7x, f32 on v5e); b3 is f32.
    # TODO(synk): nn.Dropout is identity in eval mode; training-time dropout
    # (pltpu.prng_random_bits masking) is intentionally not implemented.
    x = x_ref[...].astype(jnp.bfloat16)

    a1 = jnp.dot(x, w1_ref[...], preferred_element_type=jnp.float32)
    h1 = jnp.tanh(a1.astype(b1_ref.dtype) + b1_ref[...]).astype(jnp.bfloat16)

    a2 = jnp.dot(h1, w2_ref[...], preferred_element_type=jnp.float32)
    h2 = jnp.tanh(a2.astype(b2_ref.dtype) + b2_ref[...]).astype(jnp.bfloat16)

    a3 = jnp.dot(h2, w3_ref[...], preferred_element_type=jnp.float32)
    o_ref[...] = (a3 + b3_ref[...]).astype(o_ref.dtype)


def prepare_head_params(w1, b1, w2, b2, w3, b3, *,
                        weight_dtype=jnp.bfloat16, elementwise_dtype=None):
    """One-time (weight-load-time) preparation.

    * Transposes PyTorch (out, in) weights to (in, out) so the kernel contracts
      with plain NN matmuls (no per-step re-layout of resident weights).
    * Casts weights to bf16 (MXU inputs); kernel accumulates in f32.
    * Zero-pads layer1-out, layer2-out and logits dims to multiples of 128.
    * Biases stored in the elementwise compute dtype (bf16 on v6e/v7x, f32 on
      v5e which lacks bf16 VPU/EUP); out_proj bias stays f32.
    """
    if elementwise_dtype is None:
        elementwise_dtype = jnp.float32 if _is_v5() else jnp.bfloat16

    H_in = w1.shape[1]
    H1, H2, L = w1.shape[0], w2.shape[0], w3.shape[0]
    H1p, H2p, Lp = _round_up(H1, 128), _round_up(H2, 128), _round_up(L, 128)

    def pad_t(w, rows, cols):  # PyTorch (out, in) -> padded (in, out)
        wt = jnp.asarray(w, weight_dtype).T
        return jnp.zeros((rows, cols), weight_dtype).at[:wt.shape[0], :wt.shape[1]].set(wt)

    def pad_b(b, cols, dtype):
        bb = jnp.asarray(b, dtype)
        return jnp.zeros((1, cols), dtype).at[0, :bb.shape[0]].set(bb)

    return {
        "w1": pad_t(w1, H_in, H1p),
        "b1": pad_b(b1, H1p, elementwise_dtype),
        "w2": pad_t(w2, H1p, H2p),
        "b2": pad_b(b2, H2p, elementwise_dtype),
        "w3": pad_t(w3, H2p, Lp),
        "b3": pad_b(b3, Lp, jnp.float32),
        "num_labels": L,
    }


def wav2vec2_classification_head(x, params, *, tm_cap=None, vmem_budget_bytes=None):
    """x: (B, H) pooled features (f32 or bf16; bf16 halves streamed HBM bytes).
    params: output of prepare_head_params."""
    w1, b1 = params["w1"], params["b1"]
    w2, b2 = params["w2"], params["b2"]
    w3, b3 = params["w3"], params["b3"]
    num_labels = params["num_labels"]

    B, H = x.shape
    assert H == w1.shape[0], (H, w1.shape)
    Lp = w3.shape[1]
    H1p, H2p = w1.shape[1], w2.shape[1]

    cap_tm, cap_vmem = _device_caps()
    if tm_cap is None:
        tm_cap = cap_tm
    if vmem_budget_bytes is None:
        vmem_budget_bytes = cap_vmem

    # Batch tiling: sublane-aligned tiles; aim for >=2 grid steps so the
    # "parallel" batch axis can shard across v7x's 2 TensorCores (free on
    # single-TC v5e/v6e), capped by the generation-aware tm_cap.
    B8 = _round_up(max(B, 1), 8)
    TM = max(8, min(tm_cap, _round_up(pl.cdiv(B8, 2), 8)))
    B_pad = _round_up(B8, TM)
    if B_pad != B:
        x = jnp.pad(x, ((0, B_pad - B), (0, 0)))
    grid = (B_pad // TM,)

    # Accurate VMEM footprint: double-buffered streamed x/out tiles,
    # (conservatively) double-buffered resident weights/biases, plus headroom
    # for in-kernel intermediates.
    x_itemsize = jnp.dtype(x.dtype).itemsize
    stream_bytes = TM * H * x_itemsize + TM * Lp * 4
    weight_bytes = (w1.nbytes + b1.nbytes + w2.nbytes + b2.nbytes
                    + w3.nbytes + b3.nbytes)
    # NOTE(synk): pipeline_mode=pl.Buffered(1) on the constant-index weight
    # specs would drop the resident double-buffer; skipped here for maximum
    # lowering compatibility and accounted for (x2) in the budget instead.
    footprint = (2 * stream_bytes + 2 * weight_bytes
                 + TM * max(H1p, H2p) * 4 + (4 << 20))
    vmem_limit = int(min(vmem_budget_bytes, max(16 << 20, footprint)))

    out_padded = pl.pallas_call(
        _head_kernel,
        out_shape=jax.ShapeDtypeStruct((B_pad, Lp), jnp.float32),
        grid=grid,
        in_specs=[
            pl.BlockSpec((TM, H), lambda i: (i, 0)),    # x: streamed per batch tile
            pl.BlockSpec(w1.shape, lambda i: (0, 0)),   # weights/biases: resident
            pl.BlockSpec(b1.shape, lambda i: (0, 0)),
            pl.BlockSpec(w2.shape, lambda i: (0, 0)),
            pl.BlockSpec(b2.shape, lambda i: (0, 0)),
            pl.BlockSpec(w3.shape, lambda i: (0, 0)),
            pl.BlockSpec(b3.shape, lambda i: (0, 0)),
        ],
        out_specs=pl.BlockSpec((TM, Lp), lambda i: (i, 0)),
        compiler_params=pltpu.CompilerParams(
            dimension_semantics=("parallel",),
            vmem_limit_bytes=vmem_limit,
        ),
    )(x, w1, b1, w2, b2, w3, b3)

    # TODO(synk): fusing the upstream (B, T, H) mean-pool into this kernel would
    # remove the pooled-features HBM round-trip; out of scope for this module.
    return out_padded[:B, :num_labels]


def _reference_f32(x, w1, b1, w2, b2, w3, b3):
    h1 = jnp.tanh(x @ w1.T + b1)
    h2 = jnp.tanh(h1 @ w2.T + b2)
    return h2 @ w3.T + b3


def _reference_like_kernel(x, params):
    """Mimics the kernel's numerics: bf16 MXU inputs, f32 accumulation,
    elementwise dtype taken from the prepared biases."""
    bf = jnp.bfloat16
    w1, b1 = params["w1"], params["b1"]
    w2, b2 = params["w2"], params["b2"]
    w3, b3 = params["w3"], params["b3"]
    h = jnp.dot(x.astype(bf), w1, preferred_element_type=jnp.float32)
    h = jnp.tanh(h.astype(b1.dtype) + b1).astype(bf)
    h = jnp.dot(h, w2, preferred_element_type=jnp.float32)
    h = jnp.tanh(h.astype(b2.dtype) + b2).astype(bf)
    out = jnp.dot(h, w3, preferred_element_type=jnp.float32) + b3
    return out[:, :params["num_labels"]]


if __name__ == "__main__":
    # Small synthetic config: hidden_size=32, num_labels=4, batch=8.
    B, H, L = 8, 32, 4
    H2 = H // 2

    key = jax.random.PRNGKey(0)
    kx, k1, k2, k3, kb1, kb2, kb3 = jax.random.split(key, 7)

    x = jax.random.normal(kx, (B, H), dtype=jnp.float32)

    # PyTorch Linear convention: weight is (out_features, in_features).
    w1 = jax.random.normal(k1, (H, H), dtype=jnp.float32) * (1.0 / jnp.sqrt(H))
    b1 = jax.random.normal(kb1, (H,), dtype=jnp.float32) * 0.01
    w2 = jax.random.normal(k2, (H2, H), dtype=jnp.float32) * (1.0 / jnp.sqrt(H))
    b2 = jax.random.normal(kb2, (H2,), dtype=jnp.float32) * 0.01
    w3 = jax.random.normal(k3, (L, H2), dtype=jnp.float32) * (1.0 / jnp.sqrt(H2))
    b3 = jax.random.normal(kb3, (L,), dtype=jnp.float32) * 0.01

    params = prepare_head_params(w1, b1, w2, b2, w3, b3)

    out = wav2vec2_classification_head(x, params)
    out = jax.block_until_ready(out)
    assert out.shape == (B, L), out.shape

    # Tight check against a reference that matches the kernel's precision,
    # loose sanity check against the pure-f32 reference.
    ref_k = _reference_like_kernel(x, params)
    ref_f = _reference_f32(x, w1, b1, w2, b2, w3, b3)
    assert jnp.allclose(out, ref_k, atol=1e-2, rtol=1e-2), "mismatch vs kernel-precision reference"
    assert jnp.allclose(out, ref_f, atol=1e-1, rtol=1e-1), "mismatch vs f32 reference"

    print("KERNEL_OK")
</pallas_src>

<mosaic_0001>
module attributes {stable_mosaic.version = 11 : i64} {
  func.func @_head_kernel(%arg0: i32, %arg1: memref<8x32xf32, #tpu.memory_space<vmem>>, %arg2: memref<32x128xbf16, #tpu.memory_space<vmem>>, %arg3: memref<1x128xbf16, #tpu.memory_space<vmem>>, %arg4: memref<128x128xbf16, #tpu.memory_space<vmem>>, %arg5: memref<1x128xbf16, #tpu.memory_space<vmem>>, %arg6: memref<128x128xbf16, #tpu.memory_space<vmem>>, %arg7: memref<1x128xf32, #tpu.memory_space<vmem>>, %arg8: memref<8x128xf32, #tpu.memory_space<vmem>>) attributes {dimension_semantics = [#tpu.dimension_semantics<parallel>], iteration_bounds = array<i64: 1>, scalar_prefetch = 0 : i64, scratch_operands = 0 : i64, tpu.core_type = #tpu.core_type<tc>, window_params = [{transform_indices = @transform_0, window_bounds = array<i64: 8, 32>}, {pipeline_mode = #tpu.pipeline_mode<synchronous>, transform_indices = @transform_1, window_bounds = array<i64: 32, 128>}, {pipeline_mode = #tpu.pipeline_mode<synchronous>, transform_indices = @transform_2, window_bounds = array<i64: 1, 128>}, {pipeline_mode = #tpu.pipeline_mode<synchronous>, transform_indices = @transform_3, window_bounds = array<i64: 128, 128>}, {pipeline_mode = #tpu.pipeline_mode<synchronous>, transform_indices = @transform_4, window_bounds = array<i64: 1, 128>}, {pipeline_mode = #tpu.pipeline_mode<synchronous>, transform_indices = @transform_5, window_bounds = array<i64: 128, 128>}, {pipeline_mode = #tpu.pipeline_mode<synchronous>, transform_indices = @transform_6, window_bounds = array<i64: 1, 128>}, {transform_indices = @transform_7, window_bounds = array<i64: 8, 128>}]} {
    %c0 = arith.constant 0 : index
    %c0_0 = arith.constant 0 : index
    %0 = vector.load %arg1[%c0, %c0_0] : memref<8x32xf32, #tpu.memory_space<vmem>>, vector<8x32xf32>
    %1 = arith.truncf %0 : vector<8x32xf32> to vector<8x32xbf16>
    %c0_1 = arith.constant 0 : index
    %c0_2 = arith.constant 0 : index
    %2 = vector.load %arg2[%c0_1, %c0_2] : memref<32x128xbf16, #tpu.memory_space<vmem>>, vector<32x128xbf16>
    %cst = arith.constant dense<0.000000e+00> : vector<8x128xf32>
    %3 = tpu.matmul %1, %2, %cst {dimension_numbers = #tpu.dot_dimension_numbers<[1], [0], [0], [1], [0, 0, 1, 1], [], []>} : vector<8x32xbf16>, vector<32x128xbf16>, vector<8x128xf32> -> vector<8x128xf32>
    %4 = arith.truncf %3 : vector<8x128xf32> to vector<8x128xbf16>
    %c0_3 = arith.constant 0 : index
    %c0_4 = arith.constant 0 : index
    %5 = vector.load %arg3[%c0_3, %c0_4] : memref<1x128xbf16, #tpu.memory_space<vmem>>, vector<1x128xbf16>
    %6 = vector.broadcast %5 : vector<1x128xbf16> to vector<8x128xbf16>
    %7 = arith.addf %4, %6 : vector<8x128xbf16>
    %8 = math.tanh %7 : vector<8x128xbf16>
    %c0_5 = arith.constant 0 : index
    %c0_6 = arith.constant 0 : index
    %9 = vector.load %arg4[%c0_5, %c0_6] : memref<128x128xbf16, #tpu.memory_space<vmem>>, vector<128x128xbf16>
    %cst_7 = arith.constant dense<0.000000e+00> : vector<8x128xf32>
    %10 = tpu.matmul %8, %9, %cst_7 {dimension_numbers = #tpu.dot_dimension_numbers<[1], [0], [0], [1], [0, 0, 1, 1], [], []>} : vector<8x128xbf16>, vector<128x128xbf16>, vector<8x128xf32> -> vector<8x128xf32>
    %11 = arith.truncf %10 : vector<8x128xf32> to vector<8x128xbf16>
    %c0_8 = arith.constant 0 : index
    %c0_9 = arith.constant 0 : index
    %12 = vector.load %arg5[%c0_8, %c0_9] : memref<1x128xbf16, #tpu.memory_space<vmem>>, vector<1x128xbf16>
    %13 = vector.broadcast %12 : vector<1x128xbf16> to vector<8x128xbf16>
    %14 = arith.addf %11, %13 : vector<8x128xbf16>
    %15 = math.tanh %14 : vector<8x128xbf16>
    %c0_10 = arith.constant 0 : index
    %c0_11 = arith.constant 0 : index
    %16 = vector.load %arg6[%c0_10, %c0_11] : memref<128x128xbf16, #tpu.memory_space<vmem>>, vector<128x128xbf16>
    %cst_12 = arith.constant dense<0.000000e+00> : vector<8x128xf32>
    %17 = tpu.matmul %15, %16, %cst_12 {dimension_numbers = #tpu.dot_dimension_numbers<[1], [0], [0], [1], [0, 0, 1, 1], [], []>} : vector<8x128xbf16>, vector<128x128xbf16>, vector<8x128xf32> -> vector<8x128xf32>
    %c0_13 = arith.constant 0 : index
    %c0_14 = arith.constant 0 : index
    %18 = vector.load %arg7[%c0_13, %c0_14] : memref<1x128xf32, #tpu.memory_space<vmem>>, vector<1x128xf32>
    %19 = vector.broadcast %18 : vector<1x128xf32> to vector<8x128xf32>
    %20 = arith.addf %17, %19 : vector<8x128xf32>
    %c0_15 = arith.constant 0 : index
    %c0_16 = arith.constant 0 : index
    %21 = vector.load %arg8[%c0_15, %c0_16] : memref<8x128xf32, #tpu.memory_space<vmem>>, vector<8x128xf32>
    tpu.vector_store %arg8[%c0_15, %c0_16], %20 {strides = array<i32>} : memref<8x128xf32, #tpu.memory_space<vmem>>, vector<8x128xf32>,
    return
  }
  func.func @transform_0(%arg0: i32) -> (i32, i32) {
    %c0_i32 = arith.constant 0 : i32
    %c0_i32_0 = arith.constant 0 : i32
    return %arg0, %c0_i32 : i32, i32
  }
  func.func @transform_1(%arg0: i32) -> (i32, i32) {
    %c0_i32 = arith.constant 0 : i32
    %c0_i32_0 = arith.constant 0 : i32
    %c0_i32_1 = arith.constant 0 : i32
    return %c0_i32, %c0_i32_0 : i32, i32
  }
  func.func @transform_2(%arg0: i32) -> (i32, i32) {
    %c0_i32 = arith.constant 0 : i32
    %c0_i32_0 = arith.constant 0 : i32
    %c0_i32_1 = arith.constant 0 : i32
    return %c0_i32, %c0_i32_0 : i32, i32
  }
  func.func @transform_3(%arg0: i32) -> (i32, i32) {
    %c0_i32 = arith.constant 0 : i32
    %c0_i32_0 = arith.constant 0 : i32
    %c0_i32_1 = arith.constant 0 : i32
    return %c0_i32, %c0_i32_0 : i32, i32
  }
  func.func @transform_4(%arg0: i32) -> (i32, i32) {
    %c0_i32 = arith.constant 0 : i32
    %c0_i32_0 = arith.constant 0 : i32
    %c0_i32_1 = arith.constant 0 : i32
    return %c0_i32, %c0_i32_0 : i32, i32
  }
  func.func @transform_5(%arg0: i32) -> (i32, i32) {
    %c0_i32 = arith.constant 0 : i32
    %c0_i32_0 = arith.constant 0 : i32
    %c0_i32_1 = arith.constant 0 : i32
    return %c0_i32, %c0_i32_0 : i32, i32
  }
  func.func @transform_6(%arg0: i32) -> (i32, i32) {
    %c0_i32 = arith.constant 0 : i32
    %c0_i32_0 = arith.constant 0 : i32
    %c0_i32_1 = arith.constant 0 : i32
    return %c0_i32, %c0_i32_0 : i32, i32
  }
  func.func @transform_7(%arg0: i32) -> (i32, i32) {
    %c0_i32 = arith.constant 0 : i32
    %c0_i32_0 = arith.constant 0 : i32
    return %arg0, %c0_i32 : i32, i32
  }
}

</mosaic_0001>

<bundles_post_ra>
// kernel: tpu_custom_call.1
= control target key start
LH: loop header
LB: loop body
LE: loop exit
PB: predicated region body
PF: predicated region fallthrough
CT: control target
= control target key end

     0   :  { %12 = vsyncpa [#allocation3], 0  ;;  %s787_s0 = inlined_call_operand.hbm [shape: f32[8,32], index: 0, kind: input, shape index: {}]   ;;  %s788_s1 = inlined_call_operand.hbm [shape: bf16[32,128], index: 1, kind: input, shape index: {}]   ;;  %s789_s2 = inlined_call_operand.vmem [shape: bf16[1,128], index: 2, kind: input, shape index: {}]   ;;  %s790_s3 = inlined_call_operand.hbm [shape: bf16[128,128], index: 3, kind: input, shape index: {}]   ;;  %s791_s4 = inlined_call_operand.vmem [shape: bf16[1,128], index: 4, kind: input, shape index: {}]   ;;  %s792_s5 = inlined_call_operand.hbm [shape: bf16[128,128], index: 5, kind: input, shape index: {}]   ;;  %s793_s6 = inlined_call_operand.vmem [shape: f32[1,128], index: 6, kind: input, shape index: {}]   ;;  %s794_s7 = inlined_call_operand.hbm [shape: f32[8,128], index: 7, kind: output, shape index: {}]  }
   0x1   :  { %13 = vsyncpa [#allocation6], 0 }
   0x2   :  { %14 = vsyncpa [#allocation9], 0 }
   0x3   :  { %15 = vsyncpa [#allocation4], 0  ;;  %s636_s24 = smov [#allocation5]   ;;  %s518_s28 = scalar_lea.hbm %s788_s1, 256 }
   0x4   :  { %s31_s25 = sshll.u32 %s636_s24, 4  ;;  %p519_p0 = scmp.ne.s32.totalorder %s788_s1, %s518_s28  ;;  %s32_s25 = int_to_ptr.vmem [resolvable:$true] %s31_s25 }
   0x5   :  { %p522_p1 = scmp.lt.u32.totalorder %s518_s28, %s788_s1 }
   0x7   :  { %p524_p2 = pnand %p522_p1, %p519_p0 }
   0x9   :  { %527 = shalt.err (!%p524_p2)
}
   0xa   :  { %s528_s10 = scalar_lea.vmem %s32_s25, 256  ;;  %p533_p4 = scmp.lt.s32.totalorder %s32_s25, %s32_s25 }
   0xb   :  { %p529_p3 = scmp.ne.s32.totalorder %s32_s25, %s528_s10  ;;  %p534_p5 = scmp.lt.s32.totalorder %s528_s10, %s528_s10 }
   0xd   :  { %p535_p6 = por %p534_p5, %p533_p4 }
   0xf   :  { %p536_p7 = pnand %p535_p6, %p529_p3 }
  0x11   :  { %539 = shalt.err (!%p536_p7)
}
  0x12   :  { %s637_s11 = smov 64   ;;  %s638_s12 = smov 4  }
  0x13   :  { %37 = dma.hbm_to_vmem [thread:$0]  %s788_s1, 256, %s32_s25, [#allocation6], %s637_s11, %s637_s11, %s638_s12  }
  0x14   :  { %s639_s15 = smov [#allocation2]   ;;  %s640_s17 = smov [#allocation7]  }
  0x15   :  { %s22_s16 = sshll.u32 %s639_s15, 4  ;;  %s45_s18 = sshll.u32 %s640_s17, 4  ;;  %s23_s16 = int_to_ptr.vmem [resolvable:$true] %s22_s16  ;;  %s46_s18 = int_to_ptr.vmem [resolvable:$true] %s45_s18 }
  0x16   :  { %s540_s21 = scalar_lea.hbm %s787_s0, 128 }
  0x17   :  { %p541_p8 = scmp.ne.s32.totalorder %s787_s0, %s540_s21  ;;  %p544_p9 = scmp.lt.u32.totalorder %s540_s21, %s787_s0 }
  0x19   :  { %p546_p10 = pnand %p544_p9, %p541_p8 }
  0x1b   :  { %549 = shalt.err (!%p546_p10)
}
  0x1c   :  { %s550_s1 = scalar_lea.vmem %s23_s16, 128  ;;  %p555_p12 = scmp.lt.s32.totalorder %s23_s16, %s23_s16 }
  0x1d   :  { %p551_p11 = scmp.ne.s32.totalorder %s23_s16, %s550_s1  ;;  %p556_p13 = scmp.lt.s32.totalorder %s550_s1, %s550_s1 }
  0x1f   :  { %p557_p0 = por %p556_p13, %p555_p12 }
  0x21   :  { %p558_p1 = pnand %p557_p0, %p551_p11 }
  0x23   :  { %561 = shalt.err (!%p558_p1)
}
  0x24   :  { %25 = dma.hbm_to_vmem [thread:$0]  %s787_s0, 128, %s23_s16, [#allocation3]  }
  0x25   :  { %s562_s30 = scalar_lea.hbm %s790_s3, 1024 }
  0x26   :  { %p563_p2 = scmp.ne.s32.totalorder %s790_s3, %s562_s30  ;;  %p566_p3 = scmp.lt.u32.totalorder %s562_s30, %s790_s3 }
  0x28   :  { %p568_p4 = pnand %p566_p3, %p563_p2 }
  0x2a   :  { %571 = shalt.err (!%p568_p4)
}
  0x2b   :  { %s572_s14 = scalar_lea.vmem %s46_s18, 1024  ;;  %p577_p6 = scmp.lt.s32.totalorder %s46_s18, %s46_s18 }
  0x2c   :  { %p573_p5 = scmp.ne.s32.totalorder %s46_s18, %s572_s14  ;;  %p578_p7 = scmp.lt.s32.totalorder %s572_s14, %s572_s14 }
  0x2e   :  { %p579_p8 = por %p578_p7, %p577_p6 }
  0x30   :  { %p580_p9 = pnand %p579_p8, %p573_p5 }
  0x32   :  { %583 = shalt.err (!%p580_p9)
}
  0x33   :  { %51 = dma.hbm_to_vmem [thread:$0]  %s790_s3, 1024, %s46_s18, [#allocation6], %s637_s11, %s637_s11, %s638_s12  }
  0x34   :  { %s641_s16 = smov [#allocation8]   ;;  %s584_s21 = scalar_lea.hbm %s792_s5, 1024 }
  0x35   :  { %s59_s17 = sshll.u32 %s641_s16, 4  ;;  %p585_p10 = scmp.ne.s32.totalorder %s792_s5, %s584_s21  ;;  %s60_s17 = int_to_ptr.vmem [resolvable:$true] %s59_s17 }
  0x36   :  { %p588_p11 = scmp.lt.u32.totalorder %s584_s21, %s792_s5 }
  0x38   :  { %p590_p12 = pnand %p588_p11, %p585_p10 }
  0x3a   :  { %593 = shalt.err (!%p590_p12)
}
  0x3b   :  { %s594_s1 = scalar_lea.vmem %s60_s17, 1024  ;;  %p599_p0 = scmp.lt.s32.totalorder %s60_s17, %s60_s17 }
  0x3c   :  { %p595_p13 = scmp.ne.s32.totalorder %s60_s17, %s594_s1  ;;  %p600_p1 = scmp.lt.s32.totalorder %s594_s1, %s594_s1 }
  0x3e   :  { %p601_p2 = por %p600_p1, %p599_p0 }
  0x40   :  { %p602_p3 = pnand %p601_p2, %p595_p13 }
  0x42   :  { %605 = shalt.err (!%p602_p3)
}
  0x43   :  { %65 = dma.hbm_to_vmem [thread:$0]  %s792_s5, 1024, %s60_s17, [#allocation9], %s637_s11, %s637_s11, %s638_s12  }
  0x44   :  { %628 = dma.done.wait [#allocation3], 128  }
  0x45   :  { %629 = vsyncadd [#allocation3], 4294967168 }
  0x46   :  { %630 = dma.done.wait [#allocation6], 1280  }
  0x47   :  { %631 = vsyncadd [#allocation6], 4294966016 }
  0x48   :  { %632 = dma.done.wait [#allocation9], 1024  }
  0x49   :  { %633 = vsyncadd [#allocation9], 4294966272  ;;  %v642_v0 = vmov 0.0   ;;  %vm643_vm0 = vmmov 0   ;;  %v496_v1 = vld [vmem:[#allocation5] sm:$0xff]   ;;  %v497_v2 = vld [vmem:[#allocation5 + $0x8] sm:$0xff]   ;;  %v148_v17 = vlaneseq }
  0x4a   :  { %439 = vmatprep.subr.bf16.mxu0 %v642_v0  ;;  %443 = vmatprep.mubr.msk.bf16.mxu0 %vm643_vm0, %v642_v0  ;;  %v81_v3 = vld [vmem:[#allocation2] sm:$0xff]  ;;  %v498_v4 = vld [vmem:[#allocation7] sm:$0xff]   ;;  %vm99_vm1 = vcmask 261120   ;;  %v500_v7 = vld [vmem:[#allocation7 + $0x10] sm:$0xff]   ;;  %s644_s28 = smov [#allocation10]  }
  0x4b   :  { %447 = vmatprep.subr.bf16.mxu1 %v642_v0  ;;  %463 = vmatprep.mubr.msk.bf16.mxu1 %vm643_vm0, %v642_v0  ;;  %v82_v5 = vpack.c.bf16 %v81_v3, %v81_v3  ;;  %v499_v6 = vld [vmem:[#allocation7 + $0x8] sm:$0xff]   ;;  %v501_v8 = vld [vmem:[#allocation7 + $0x18] sm:$0xff]   ;;  %v502_v9 = vld [vmem:[#allocation7 + $0x20] sm:$0xff]   ;;  %v149_v18 = vshrl.u32 %v148_v17, 7  ;;  %s387_s29 = sshll.u32 %s644_s28, 4  ;;  %s388_s29 = int_to_ptr.vmem [resolvable:$true] %s387_s29 }
  0x4c   :  { %440 = vmatpush3.bf16.msra.mxu0 %v496_v1  ;;  %448 = vmatpush3.bf16.msra.mxu1 %v498_v4  ;;  %v503_v10 = vld [vmem:[#allocation7 + $0x28] sm:$0xff]   ;;  %v504_v11 = vld [vmem:[#allocation7 + $0x30] sm:$0xff]   ;;  %v505_v12 = vld [vmem:[#allocation7 + $0x38] sm:$0xff]   ;;  %p611_p5 = scmp.lt.s32.totalorder %s388_s29, %s388_s29 }
  0x4d   :  { %441 = vmatprep.subr.bf16.mxu0 %v642_v0  ;;  %449 = vmatprep.subr.bf16.mxu1 %v642_v0  ;;  %v506_v13 = vld [vmem:[#allocation8] sm:$0xff]   ;;  %v507_v14 = vld [vmem:[#allocation8 + $0x8] sm:$0xff]   ;;  %v508_v15 = vld [vmem:[#allocation8 + $0x10] sm:$0xff]   ;;  %v150_v21 = vsub.s32 0, %v149_v18 }
  0x4e   :  { %v509_v16 = vld [vmem:[#allocation8 + $0x18] sm:$0xff]   ;;  %v144_v19 = vld [vmem:[%s789_s2] sm:$0x1]  ;;  %v510_v30 = vld [vmem:[#allocation8 + $0x20] sm:$0xff]  }
  0x4f   :  { %v146_v20 = vpack.i.b16 %v144_v19, %v144_v19  ;;  %v511_v31 = vld [vmem:[#allocation8 + $0x28] sm:$0xff]   ;;  %v512_v32 = vld [vmem:[#allocation8 + $0x30] sm:$0xff]   ;;  %v513_v33 = vld [vmem:[#allocation8 + $0x38] sm:$0xff]  }
  0x50   :  { %442 = vmatpush3.bf16.msra.mxu0 %v497_v2  ;;  %450 = vmatpush3.bf16.msra.mxu1 %v499_v6  ;;  %v259_v34 = vld [vmem:[%s791_s4] sm:$0x1]  ;;  %s606_s4 = scalar_lea.vmem %s388_s29, 128 }
  0x51   :  { %467 = vmatprep.subr.bf16.mxu0 %v642_v0  ;;  %451 = vmatprep.subr.bf16.mxu1 %v642_v0  ;;  %v151_v22 = vrot.slane %v146_v20, %v150_v21  ;;  %v261_v35 = vpack.i.b16 %v259_v34, %v259_v34  ;;  %v409_v44 = vld [vmem:[%s793_s6] ss:$0 sm:$0xff]  ;;  %p607_p4 = scmp.ne.s32.totalorder %s388_s29, %s606_s4  ;;  %p612_p6 = scmp.lt.s32.totalorder %s606_s4, %s606_s4 }
  0x53   :  { %444 = vmatmul.mubr.msk.bf16.vlgmr.msra.gmra.mrb[0].mxu0 %vm99_vm1, %v82_v5  ;;  %v266_v36 = vrot.slane %v261_v35, %v150_v21  ;;  %p613_p7 = por %p612_p6, %p611_p5 }
  0x54   :  { %483 = vmatprep.mubr.msk.bf16.mxu0 %vm643_vm0, %v642_v0  ;;  %452 = vmatpush3.bf16.msra.mxu1 %v500_v7 }
  0x55   :  { %453 = vmatprep.subr.bf16.mxu1 %v642_v0  ;;  %468 = vmatpush3.bf16.msra.mxu0 %v506_v13  ;;  %p614_p8 = pnand %p613_p7, %p607_p4 }
  0x56   :  { %469 = vmatprep.subr.bf16.mxu0 %v642_v0 }
  0x58   :  { %454 = vmatpush3.bf16.msra.mxu1 %v501_v8 }
  0x59   :  { %455 = vmatprep.subr.bf16.mxu1 %v642_v0  ;;  %470 = vmatpush3.bf16.msra.mxu0 %v507_v14 }
  0x5a   :  { %471 = vmatprep.subr.bf16.mxu0 %v642_v0 }
  0x5c   :  { %456 = vmatpush3.bf16.msra.mxu1 %v502_v9 }
  0x5d   :  { %457 = vmatprep.subr.bf16.mxu1 %v642_v0  ;;  %472 = vmatpush3.bf16.msra.mxu0 %v508_v15 }
  0x5e   :  { %473 = vmatprep.subr.bf16.mxu0 %v642_v0 }
  0x60   :  { %458 = vmatpush3.bf16.msra.mxu1 %v503_v10 }
  0x61   :  { %459 = vmatprep.subr.bf16.mxu1 %v642_v0  ;;  %474 = vmatpush3.bf16.msra.mxu0 %v509_v16 }
  0x62   :  { %475 = vmatprep.subr.bf16.mxu0 %v642_v0 }
  0x64   :  { %460 = vmatpush3.bf16.msra.mxu1 %v504_v11 }
  0x65   :  { %461 = vmatprep.subr.bf16.mxu1 %v642_v0  ;;  %476 = vmatpush3.bf16.msra.mxu0 %v510_v30 }
  0x66   :  { %477 = vmatprep.subr.bf16.mxu0 %v642_v0 }
  0x68   :  { %462 = vmatpush3.bf16.msra.mxu1 %v505_v12 }
  0x69   :  { %478 = vmatpush3.bf16.msra.mxu0 %v511_v31 }
  0x6a   :  { %479 = vmatprep.subr.bf16.mxu0 %v642_v0 }
  0x6d   :  { %480 = vmatpush3.bf16.msra.mxu0 %v512_v32 }
  0x6e   :  { %481 = vmatprep.subr.bf16.mxu0 %v642_v0 }
  0x71   :  { %482 = vmatpush3.bf16.msra.mxu0 %v513_v33 }
 0x126   :  { %v137_v23 = vpop.f32.mrb[0].mxu0 }
 0x127   :  { %v143_v24 = vpack.c.bf16 %v137_v23, %v137_v23  ;;  %v445_v25 = vpop.f32.mrb[1].mxu0 }
 0x128   :  { %v140_v26 = vpop.f32.mrb[2].mxu0 }
 0x129   :  { %v152_v27 = vadd.bf16 %v151_v22, %v143_v24  ;;  %v446_v28 = vpop.f32.mrb[3].mxu0 }
 0x12b   :  { %514 = vtanh.bf16 %v152_v27 }
 0x136   :  { %v515_v29 = vpop.eup %514 }
 0x137   :  { %464 = vmatmul.mubr.bf16.vlgmr.msra.gmra.mrb[0].mxu1 %v515_v29 }
 0x20a   :  { %v252_v37 = vpop.f32.mrb[0].mxu1 }
 0x20b   :  { %v258_v38 = vpack.c.bf16 %v252_v37, %v252_v37  ;;  %v465_v39 = vpop.f32.mrb[1].mxu1 }
 0x20c   :  { %v255_v40 = vpop.f32.mrb[2].mxu1 }
 0x20d   :  { %v267_v41 = vadd.bf16 %v266_v36, %v258_v38  ;;  %v466_v42 = vpop.f32.mrb[3].mxu1 }
 0x20f   :  { %516 = vtanh.bf16 %v267_v41 }
 0x21a   :  { %v517_v43 = vpop.eup %516 }
 0x21b   :  { %484 = vmatmul.mubr.bf16.vlgmr.msra.gmra.mrb[4].mxu0 %v517_v43 }
 0x2ee   :  { %v374_v45 = vpop.f32.mrb[4].mxu0 }
 0x2ef   :  { %v375_v46 = vadd.f32 %v409_v44, %v374_v45  ;;  %v485_v47 = vpop.f32.mrb[5].mxu0 }
 0x2f0   :  { %v377_v48 = vpop.f32.mrb[6].mxu0 }
 0x2f1   :  { %380 = vst [vmem:[#allocation10] sm:$0xff] %v375_v46  ;;  %v486_v49 = vpop.f32.mrb[7].mxu0 }
 0x2f2   :  { %617 = shalt.err (!%p614_p8)
}
 0x2f3   :  { %s618_s6 = scalar_lea.hbm %s794_s7, 128 }
 0x2f4   :  { %p619_p9 = scmp.ne.s32.totalorder %s794_s7, %s618_s6  ;;  %p622_p10 = scmp.lt.u32.totalorder %s618_s6, %s794_s7 }
 0x2f6   :  { %p624_p11 = pnand %p622_p10, %p619_p9 }
 0x2f8   :  { %627 = shalt.err (!%p624_p11)
}
 0x2f9   :  { %390 = dma.vmem_to_hbm [thread:$0]  %s388_s29, 128, %s794_s7, [#allocation4]  }
 0x2fa   :  { %634 = dma.done.wait [#allocation4], 128  }
 0x2fb   :  { %635 = vsyncadd [#allocation4], 4294967168 }
 0x2fc   :  { %394 = vsyncpa [#allocation3], 1 }
 0x2fd   :  { %395 = vsyncpa [#allocation6], 1 }
 0x2fe   :  { %396 = vsyncpa [#allocation9], 1 }
 0x2ff   :  { %397 = vsyncpa [#allocation4], 1 }

</bundles_post_ra>
